<compile_context>
chip_gen: v5e
topology: v5e:2x2
jax: 0.10.0
libtpu: 0.0.40
codegen_flags: <defaults>
</compile_context>

<pallas_src>
import jax
import jax.numpy as jnp
from jax.experimental import pallas as pl
from jax.experimental.pallas import tpu as pltpu


def _round_up(a: int, m: int) -> int:
    return (a + m - 1) // m * m


def tagger_kernel(ids_ref, table_ref, w1_ref, b1_ref, w2_ref, b2_ref,
                  out_ref, acc_ref):
    """One fused batch-tile of Tagger_Net.

    ids_ref   : (TB, D_in)    int32   token ids (streamed per grid step)
    table_ref : (V_pad, E)    float32 embedding table (resident)
    w1_ref    : (D_in, E, H)  float32 linear1 weight per token position (resident)
    b1_ref    : (1, H)        float32 linear1 bias (resident)
    w2_ref    : (H, N_pad)    float32 linear2 weight, lane-padded (resident)
    b2_ref    : (1, N_pad)    float32 linear2 bias, lane-padded (resident)
    out_ref   : (TB, N_pad)   float32 logits slab (lane-dense stores)
    acc_ref   : (TB, H)       float32 VMEM scratch for the hidden layer
    """
    tb = out_ref.shape[0]
    d_in, _, _ = w1_ref.shape
    v_pad = table_ref.shape[0]

    ids = ids_ref[...]                                    # (TB, D_in)
    table = table_ref[...]                                # (V_pad, E), hoisted
    vocab_iota = jax.lax.broadcasted_iota(jnp.int32, (tb, v_pad), 1)  # hoisted

    acc_ref[...] = jnp.zeros_like(acc_ref)
    # Statically-unrolled loop over context positions:
    # flatten(emb) @ W1 == sum_d emb[:, d, :] @ W1[d].
    for d in range(d_in):
        onehot = (ids[:, d:d + 1] == vocab_iota).astype(jnp.float32)  # (TB, V_pad)
        emb_d = jnp.dot(onehot, table,
                        preferred_element_type=jnp.float32)           # (TB, E)
        acc_ref[...] += jnp.dot(emb_d, w1_ref[d],
                                preferred_element_type=jnp.float32)   # (TB, H)

    hidden = jnp.tanh(acc_ref[...] + b1_ref[...])                     # (TB, H)
    out_ref[...] = (jnp.dot(hidden, w2_ref[...],
                            preferred_element_type=jnp.float32)
                    + b2_ref[...]).astype(out_ref.dtype)


def tagger_net_forward(x, emb_table, w1, b1, w2, b2, *, batch_tile=None):
    """Forward pass of Tagger_Net (same semantics as the PyTorch module).

    x         : (B, D_in)   int32 token indices
    emb_table : (V, E)      float32
    w1        : (D_in*E, H) float32 (= linear1.weight.T), b1: (H,)
    w2        : (H, D_out)  float32 (= linear2.weight.T), b2: (D_out,)
    returns   : (B, D_out)  float32 logits
    """
    B, D_in = x.shape
    V, E = emb_table.shape
    KE, H = w1.shape
    D_out = w2.shape[1]
    assert KE == D_in * E

    # Batch tile: stream in up-to-512-row tiles (multiple of 8 sublanes).  The
    # per-tile VMEM footprint (ids + 128-lane out slab, double buffered, plus
    # the (TB, H) scratch and resident weights) is far below v7x's 64 MiB even
    # at TB=512, so the same tiling is safe on v5e/v6e/v7x.
    TB = batch_tile if batch_tile is not None else min(512, _round_up(B, 8))
    B_pad = _round_up(B, TB)
    V_pad = _round_up(V, 128)                  # lane-dense one-hot / aligned K
    N_pad = _round_up(max(D_out, 128), 128)    # lane-dense output stores

    x_p = x if B_pad == B else jnp.pad(x, ((0, B_pad - B), (0, 0)))
    table_p = emb_table if V_pad == V else jnp.pad(
        emb_table, ((0, V_pad - V), (0, 0)))
    w1_3d = w1.reshape(D_in, E, H)
    b1_2d = b1.reshape(1, H)
    w2_p = jnp.pad(w2, ((0, 0), (0, N_pad - D_out)))
    b2_p = jnp.pad(b2, ((0, N_pad - D_out),)).reshape(1, N_pad)

    grid = (B_pad // TB,)

    grid_spec = pltpu.PrefetchScalarGridSpec(
        num_scalar_prefetch=0,
        grid=grid,
        in_specs=[
            pl.BlockSpec((TB, D_in), lambda i: (i, 0)),       # ids (streamed)
            pl.BlockSpec((V_pad, E), lambda i: (0, 0)),       # table (resident)
            pl.BlockSpec((D_in, E, H), lambda i: (0, 0, 0)),  # w1 (resident)
            pl.BlockSpec((1, H), lambda i: (0, 0)),           # b1 (resident)
            pl.BlockSpec((H, N_pad), lambda i: (0, 0)),       # w2 (resident)
            pl.BlockSpec((1, N_pad), lambda i: (0, 0)),       # b2 (resident)
        ],
        out_specs=pl.BlockSpec((TB, N_pad), lambda i: (i, 0)),
        scratch_shapes=[pltpu.VMEM((TB, H), jnp.float32)],
    )

    out_padded = pl.pallas_call(
        tagger_kernel,
        out_shape=jax.ShapeDtypeStruct((B_pad, N_pad), jnp.float32),
        grid_spec=grid_spec,
        compiler_params=pltpu.CompilerParams(
            dimension_semantics=("parallel",),   # batch axis -> both TCs on v7x
            vmem_limit_bytes=32 * 1024 * 1024,
        ),
    )(x_p, table_p, w1_3d, b1_2d, w2_p, b2_p)

    return out_padded[:B, :D_out]


if __name__ == "__main__":
    # Small, deterministic synthetic configuration.
    V = 100      # vocabulary size
    E = 32       # embedding dim
    D_in = 5     # context window length (tokens per example)
    H = 32       # hidden dim
    D_out = 8    # number of tags
    B = 8        # batch size

    key = jax.random.PRNGKey(0)
    k_emb, k_w1, k_b1, k_w2, k_b2, k_x = jax.random.split(key, 6)

    # Deterministic parameter init (stand-in for utils.VECS and nn.Linear init).
    emb_table = jax.random.normal(k_emb, (V, E), dtype=jnp.float32) * 0.1
    w1 = jax.random.normal(k_w1, (D_in * E, H), dtype=jnp.float32) * 0.05
    b1 = jax.random.normal(k_b1, (H,), dtype=jnp.float32) * 0.05
    w2 = jax.random.normal(k_w2, (H, D_out), dtype=jnp.float32) * 0.05
    b2 = jax.random.normal(k_b2, (D_out,), dtype=jnp.float32) * 0.05

    x = jax.random.randint(k_x, (B, D_in), minval=0, maxval=V, dtype=jnp.int32)

    out = tagger_net_forward(x, emb_table, w1, b1, w2, b2)
    out = jax.block_until_ready(out)

    # Pure-JAX reference check of the same math.
    ref = jnp.take(emb_table, x, axis=0).reshape(B, -1)
    ref = jnp.tanh(ref @ w1 + b1) @ w2 + b2
    assert out.shape == (B, D_out)
    assert jnp.allclose(out, ref, atol=1e-5, rtol=1e-5), float(
        jnp.abs(out - ref).max())

    print("KERNEL_OK")
</pallas_src>

<mosaic_0001>
module attributes {stable_mosaic.version = 11 : i64} {
  func.func @tagger_kernel(%arg0: i32, %arg1: memref<8x5xi32, #tpu.memory_space<vmem>>, %arg2: memref<128x32xf32, #tpu.memory_space<vmem>>, %arg3: memref<5x32x32xf32, #tpu.memory_space<vmem>>, %arg4: memref<1x32xf32, #tpu.memory_space<vmem>>, %arg5: memref<32x128xf32, #tpu.memory_space<vmem>>, %arg6: memref<1x128xf32, #tpu.memory_space<vmem>>, %arg7: memref<8x128xf32, #tpu.memory_space<vmem>>, %arg8: memref<8x32xf32, #tpu.memory_space<vmem>>) attributes {dimension_semantics = [#tpu.dimension_semantics<parallel>], iteration_bounds = array<i64: 1>, scalar_prefetch = 0 : i64, scratch_operands = 1 : i64, tpu.core_type = #tpu.core_type<tc>, window_params = [{transform_indices = @transform_0, window_bounds = array<i64: 8, 5>}, {pipeline_mode = #tpu.pipeline_mode<synchronous>, transform_indices = @transform_1, window_bounds = array<i64: 128, 32>}, {pipeline_mode = #tpu.pipeline_mode<synchronous>, transform_indices = @transform_2, window_bounds = array<i64: 5, 32, 32>}, {pipeline_mode = #tpu.pipeline_mode<synchronous>, transform_indices = @transform_3, window_bounds = array<i64: 1, 32>}, {pipeline_mode = #tpu.pipeline_mode<synchronous>, transform_indices = @transform_4, window_bounds = array<i64: 32, 128>}, {pipeline_mode = #tpu.pipeline_mode<synchronous>, transform_indices = @transform_5, window_bounds = array<i64: 1, 128>}, {transform_indices = @transform_6, window_bounds = array<i64: 8, 128>}]} {
    %c0 = arith.constant 0 : index
    %c0_0 = arith.constant 0 : index
    %0 = vector.load %arg1[%c0, %c0_0] : memref<8x5xi32, #tpu.memory_space<vmem>>, vector<8x5xi32>
    %c0_1 = arith.constant 0 : index
    %c0_2 = arith.constant 0 : index
    %1 = vector.load %arg2[%c0_1, %c0_2] : memref<128x32xf32, #tpu.memory_space<vmem>>, vector<128x32xf32>
    %2 = tpu.iota {dimensions = array<i32: 1>} : vector<8x128xi32>
    %cst = arith.constant 0.000000e+00 : f32
    %3 = vector.broadcast %cst : f32 to vector<8x32xf32>
    %c0_3 = arith.constant 0 : index
    %c0_4 = arith.constant 0 : index
    %4 = vector.load %arg8[%c0_3, %c0_4] : memref<8x32xf32, #tpu.memory_space<vmem>>, vector<8x32xf32>
    tpu.vector_store %arg8[%c0_3, %c0_4], %3 {strides = array<i32>} : memref<8x32xf32, #tpu.memory_space<vmem>>, vector<8x32xf32>,
    %5 = vector.extract_strided_slice %0 {offsets = [0, 0], sizes = [8, 1], strides = [1, 1]} : vector<8x5xi32> to vector<8x1xi32>
    %6 = vector.broadcast %5 : vector<8x1xi32> to vector<8x128xi32>
    %7 = arith.cmpi eq, %6, %2 : vector<8x128xi32>
    %8 = arith.extui %7 : vector<8x128xi1> to vector<8x128xi32>
    %9 = arith.sitofp %8 : vector<8x128xi32> to vector<8x128xf32>
    %cst_5 = arith.constant dense<0.000000e+00> : vector<8x32xf32>
    %10 = tpu.matmul %9, %1, %cst_5 {dimension_numbers = #tpu.dot_dimension_numbers<[1], [0], [0], [1], [0, 0, 1, 1], [], []>} : vector<8x128xf32>, vector<128x32xf32>, vector<8x32xf32> -> vector<8x32xf32>
    %c0_6 = arith.constant 0 : index
    %c0_7 = arith.constant 0 : index
    %11 = vector.load %arg8[%c0_6, %c0_7] : memref<8x32xf32, #tpu.memory_space<vmem>>, vector<8x32xf32>
    %c0_8 = arith.constant 0 : index
    %c0_9 = arith.constant 0 : index
    %c0_10 = arith.constant 0 : index
    %12 = vector.load %arg3[%c0_8, %c0_9, %c0_10] : memref<5x32x32xf32, #tpu.memory_space<vmem>>, vector<1x32x32xf32>
    %13 = vector.shape_cast %12 : vector<1x32x32xf32> to vector<32x32xf32>
    %cst_11 = arith.constant dense<0.000000e+00> : vector<8x32xf32>
    %14 = tpu.matmul %10, %13, %cst_11 {dimension_numbers = #tpu.dot_dimension_numbers<[1], [0], [0], [1], [0, 0, 1, 1], [], []>} : vector<8x32xf32>, vector<32x32xf32>, vector<8x32xf32> -> vector<8x32xf32>
    %15 = arith.addf %11, %14 : vector<8x32xf32>
    %c0_12 = arith.constant 0 : index
    %c0_13 = arith.constant 0 : index
    %16 = vector.load %arg8[%c0_12, %c0_13] : memref<8x32xf32, #tpu.memory_space<vmem>>, vector<8x32xf32>
    tpu.vector_store %arg8[%c0_12, %c0_13], %15 {strides = array<i32>} : memref<8x32xf32, #tpu.memory_space<vmem>>, vector<8x32xf32>,
    %17 = vector.extract_strided_slice %0 {offsets = [0, 1], sizes = [8, 1], strides = [1, 1]} : vector<8x5xi32> to vector<8x1xi32>
    %18 = vector.broadcast %17 : vector<8x1xi32> to vector<8x128xi32>
    %19 = arith.cmpi eq, %18, %2 : vector<8x128xi32>
    %20 = arith.extui %19 : vector<8x128xi1> to vector<8x128xi32>
    %21 = arith.sitofp %20 : vector<8x128xi32> to vector<8x128xf32>
    %cst_14 = arith.constant dense<0.000000e+00> : vector<8x32xf32>
    %22 = tpu.matmul %21, %1, %cst_14 {dimension_numbers = #tpu.dot_dimension_numbers<[1], [0], [0], [1], [0, 0, 1, 1], [], []>} : vector<8x128xf32>, vector<128x32xf32>, vector<8x32xf32> -> vector<8x32xf32>
    %c0_15 = arith.constant 0 : index
    %c0_16 = arith.constant 0 : index
    %23 = vector.load %arg8[%c0_15, %c0_16] : memref<8x32xf32, #tpu.memory_space<vmem>>, vector<8x32xf32>
    %c1 = arith.constant 1 : index
    %c0_17 = arith.constant 0 : index
    %c0_18 = arith.constant 0 : index
    %24 = vector.load %arg3[%c1, %c0_17, %c0_18] : memref<5x32x32xf32, #tpu.memory_space<vmem>>, vector<1x32x32xf32>
    %25 = vector.shape_cast %24 : vector<1x32x32xf32> to vector<32x32xf32>
    %cst_19 = arith.constant dense<0.000000e+00> : vector<8x32xf32>
    %26 = tpu.matmul %22, %25, %cst_19 {dimension_numbers = #tpu.dot_dimension_numbers<[1], [0], [0], [1], [0, 0, 1, 1], [], []>} : vector<8x32xf32>, vector<32x32xf32>, vector<8x32xf32> -> vector<8x32xf32>
    %27 = arith.addf %23, %26 : vector<8x32xf32>
    %c0_20 = arith.constant 0 : index
    %c0_21 = arith.constant 0 : index
    %28 = vector.load %arg8[%c0_20, %c0_21] : memref<8x32xf32, #tpu.memory_space<vmem>>, vector<8x32xf32>
    tpu.vector_store %arg8[%c0_20, %c0_21], %27 {strides = array<i32>} : memref<8x32xf32, #tpu.memory_space<vmem>>, vector<8x32xf32>,
    %29 = vector.extract_strided_slice %0 {offsets = [0, 2], sizes = [8, 1], strides = [1, 1]} : vector<8x5xi32> to vector<8x1xi32>
    %30 = vector.broadcast %29 : vector<8x1xi32> to vector<8x128xi32>
    %31 = arith.cmpi eq, %30, %2 : vector<8x128xi32>
    %32 = arith.extui %31 : vector<8x128xi1> to vector<8x128xi32>
    %33 = arith.sitofp %32 : vector<8x128xi32> to vector<8x128xf32>
    %cst_22 = arith.constant dense<0.000000e+00> : vector<8x32xf32>
    %34 = tpu.matmul %33, %1, %cst_22 {dimension_numbers = #tpu.dot_dimension_numbers<[1], [0], [0], [1], [0, 0, 1, 1], [], []>} : vector<8x128xf32>, vector<128x32xf32>, vector<8x32xf32> -> vector<8x32xf32>
    %c0_23 = arith.constant 0 : index
    %c0_24 = arith.constant 0 : index
    %35 = vector.load %arg8[%c0_23, %c0_24] : memref<8x32xf32, #tpu.memory_space<vmem>>, vector<8x32xf32>
    %c2 = arith.constant 2 : index
    %c0_25 = arith.constant 0 : index
    %c0_26 = arith.constant 0 : index
    %36 = vector.load %arg3[%c2, %c0_25, %c0_26] : memref<5x32x32xf32, #tpu.memory_space<vmem>>, vector<1x32x32xf32>
    %37 = vector.shape_cast %36 : vector<1x32x32xf32> to vector<32x32xf32>
    %cst_27 = arith.constant dense<0.000000e+00> : vector<8x32xf32>
    %38 = tpu.matmul %34, %37, %cst_27 {dimension_numbers = #tpu.dot_dimension_numbers<[1], [0], [0], [1], [0, 0, 1, 1], [], []>} : vector<8x32xf32>, vector<32x32xf32>, vector<8x32xf32> -> vector<8x32xf32>
    %39 = arith.addf %35, %38 : vector<8x32xf32>
    %c0_28 = arith.constant 0 : index
    %c0_29 = arith.constant 0 : index
    %40 = vector.load %arg8[%c0_28, %c0_29] : memref<8x32xf32, #tpu.memory_space<vmem>>, vector<8x32xf32>
    tpu.vector_store %arg8[%c0_28, %c0_29], %39 {strides = array<i32>} : memref<8x32xf32, #tpu.memory_space<vmem>>, vector<8x32xf32>,
    %41 = vector.extract_strided_slice %0 {offsets = [0, 3], sizes = [8, 1], strides = [1, 1]} : vector<8x5xi32> to vector<8x1xi32>
    %42 = vector.broadcast %41 : vector<8x1xi32> to vector<8x128xi32>
    %43 = arith.cmpi eq, %42, %2 : vector<8x128xi32>
    %44 = arith.extui %43 : vector<8x128xi1> to vector<8x128xi32>
    %45 = arith.sitofp %44 : vector<8x128xi32> to vector<8x128xf32>
    %cst_30 = arith.constant dense<0.000000e+00> : vector<8x32xf32>
    %46 = tpu.matmul %45, %1, %cst_30 {dimension_numbers = #tpu.dot_dimension_numbers<[1], [0], [0], [1], [0, 0, 1, 1], [], []>} : vector<8x128xf32>, vector<128x32xf32>, vector<8x32xf32> -> vector<8x32xf32>
    %c0_31 = arith.constant 0 : index
    %c0_32 = arith.constant 0 : index
    %47 = vector.load %arg8[%c0_31, %c0_32] : memref<8x32xf32, #tpu.memory_space<vmem>>, vector<8x32xf32>
    %c3 = arith.constant 3 : index
    %c0_33 = arith.constant 0 : index
    %c0_34 = arith.constant 0 : index
    %48 = vector.load %arg3[%c3, %c0_33, %c0_34] : memref<5x32x32xf32, #tpu.memory_space<vmem>>, vector<1x32x32xf32>
    %49 = vector.shape_cast %48 : vector<1x32x32xf32> to vector<32x32xf32>
    %cst_35 = arith.constant dense<0.000000e+00> : vector<8x32xf32>
    %50 = tpu.matmul %46, %49, %cst_35 {dimension_numbers = #tpu.dot_dimension_numbers<[1], [0], [0], [1], [0, 0, 1, 1], [], []>} : vector<8x32xf32>, vector<32x32xf32>, vector<8x32xf32> -> vector<8x32xf32>
    %51 = arith.addf %47, %50 : vector<8x32xf32>
    %c0_36 = arith.constant 0 : index
    %c0_37 = arith.constant 0 : index
    %52 = vector.load %arg8[%c0_36, %c0_37] : memref<8x32xf32, #tpu.memory_space<vmem>>, vector<8x32xf32>
    tpu.vector_store %arg8[%c0_36, %c0_37], %51 {strides = array<i32>} : memref<8x32xf32, #tpu.memory_space<vmem>>, vector<8x32xf32>,
    %53 = vector.extract_strided_slice %0 {offsets = [0, 4], sizes = [8, 1], strides = [1, 1]} : vector<8x5xi32> to vector<8x1xi32>
    %54 = vector.broadcast %53 : vector<8x1xi32> to vector<8x128xi32>
    %55 = arith.cmpi eq, %54, %2 : vector<8x128xi32>
    %56 = arith.extui %55 : vector<8x128xi1> to vector<8x128xi32>
    %57 = arith.sitofp %56 : vector<8x128xi32> to vector<8x128xf32>
    %cst_38 = arith.constant dense<0.000000e+00> : vector<8x32xf32>
    %58 = tpu.matmul %57, %1, %cst_38 {dimension_numbers = #tpu.dot_dimension_numbers<[1], [0], [0], [1], [0, 0, 1, 1], [], []>} : vector<8x128xf32>, vector<128x32xf32>, vector<8x32xf32> -> vector<8x32xf32>
    %c0_39 = arith.constant 0 : index
    %c0_40 = arith.constant 0 : index
    %59 = vector.load %arg8[%c0_39, %c0_40] : memref<8x32xf32, #tpu.memory_space<vmem>>, vector<8x32xf32>
    %c4 = arith.constant 4 : index
    %c0_41 = arith.constant 0 : index
    %c0_42 = arith.constant 0 : index
    %60 = vector.load %arg3[%c4, %c0_41, %c0_42] : memref<5x32x32xf32, #tpu.memory_space<vmem>>, vector<1x32x32xf32>
    %61 = vector.shape_cast %60 : vector<1x32x32xf32> to vector<32x32xf32>
    %cst_43 = arith.constant dense<0.000000e+00> : vector<8x32xf32>
    %62 = tpu.matmul %58, %61, %cst_43 {dimension_numbers = #tpu.dot_dimension_numbers<[1], [0], [0], [1], [0, 0, 1, 1], [], []>} : vector<8x32xf32>, vector<32x32xf32>, vector<8x32xf32> -> vector<8x32xf32>
    %63 = arith.addf %59, %62 : vector<8x32xf32>
    %c0_44 = arith.constant 0 : index
    %c0_45 = arith.constant 0 : index
    %64 = vector.load %arg8[%c0_44, %c0_45] : memref<8x32xf32, #tpu.memory_space<vmem>>, vector<8x32xf32>
    tpu.vector_store %arg8[%c0_44, %c0_45], %63 {strides = array<i32>} : memref<8x32xf32, #tpu.memory_space<vmem>>, vector<8x32xf32>,
    %c0_46 = arith.constant 0 : index
    %c0_47 = arith.constant 0 : index
    %65 = vector.load %arg8[%c0_46, %c0_47] : memref<8x32xf32, #tpu.memory_space<vmem>>, vector<8x32xf32>
    %c0_48 = arith.constant 0 : index
    %c0_49 = arith.constant 0 : index
    %66 = vector.load %arg4[%c0_48, %c0_49] : memref<1x32xf32, #tpu.memory_space<vmem>>, vector<1x32xf32>
    %67 = vector.broadcast %66 : vector<1x32xf32> to vector<8x32xf32>
    %68 = arith.addf %65, %67 : vector<8x32xf32>
    %69 = math.tanh %68 : vector<8x32xf32>
    %c0_50 = arith.constant 0 : index
    %c0_51 = arith.constant 0 : index
    %70 = vector.load %arg5[%c0_50, %c0_51] : memref<32x128xf32, #tpu.memory_space<vmem>>, vector<32x128xf32>
    %cst_52 = arith.constant dense<0.000000e+00> : vector<8x128xf32>
    %71 = tpu.matmul %69, %70, %cst_52 {dimension_numbers = #tpu.dot_dimension_numbers<[1], [0], [0], [1], [0, 0, 1, 1], [], []>} : vector<8x32xf32>, vector<32x128xf32>, vector<8x128xf32> -> vector<8x128xf32>
    %c0_53 = arith.constant 0 : index
    %c0_54 = arith.constant 0 : index
    %72 = vector.load %arg6[%c0_53, %c0_54] : memref<1x128xf32, #tpu.memory_space<vmem>>, vector<1x128xf32>
    %73 = vector.broadcast %72 : vector<1x128xf32> to vector<8x128xf32>
    %74 = arith.addf %71, %73 : vector<8x128xf32>
    %c0_55 = arith.constant 0 : index
    %c0_56 = arith.constant 0 : index
    %75 = vector.load %arg7[%c0_55, %c0_56] : memref<8x128xf32, #tpu.memory_space<vmem>>, vector<8x128xf32>
    tpu.vector_store %arg7[%c0_55, %c0_56], %74 {strides = array<i32>} : memref<8x128xf32, #tpu.memory_space<vmem>>, vector<8x128xf32>,
    return
  }
  func.func @transform_0(%arg0: i32) -> (i32, i32) {
    %c0_i32 = arith.constant 0 : i32
    %c0_i32_0 = arith.constant 0 : i32
    return %arg0, %c0_i32 : i32, i32
  }
  func.func @transform_1(%arg0: i32) -> (i32, i32) {
    %c0_i32 = arith.constant 0 : i32
    %c0_i32_0 = arith.constant 0 : i32
    %c0_i32_1 = arith.constant 0 : i32
    return %c0_i32, %c0_i32_0 : i32, i32
  }
  func.func @transform_2(%arg0: i32) -> (i32, i32, i32) {
    %c0_i32 = arith.constant 0 : i32
    %c0_i32_0 = arith.constant 0 : i32
    %c0_i32_1 = arith.constant 0 : i32
    %c0_i32_2 = arith.constant 0 : i32
    return %c0_i32, %c0_i32_0, %c0_i32_1 : i32, i32, i32
  }
  func.func @transform_3(%arg0: i32) -> (i32, i32) {
    %c0_i32 = arith.constant 0 : i32
    %c0_i32_0 = arith.constant 0 : i32
    %c0_i32_1 = arith.constant 0 : i32
    return %c0_i32, %c0_i32_0 : i32, i32
  }
  func.func @transform_4(%arg0: i32) -> (i32, i32) {
    %c0_i32 = arith.constant 0 : i32
    %c0_i32_0 = arith.constant 0 : i32
    %c0_i32_1 = arith.constant 0 : i32
    return %c0_i32, %c0_i32_0 : i32, i32
  }
  func.func @transform_5(%arg0: i32) -> (i32, i32) {
    %c0_i32 = arith.constant 0 : i32
    %c0_i32_0 = arith.constant 0 : i32
    %c0_i32_1 = arith.constant 0 : i32
    return %c0_i32, %c0_i32_0 : i32, i32
  }
  func.func @transform_6(%arg0: i32) -> (i32, i32) {
    %c0_i32 = arith.constant 0 : i32
    %c0_i32_0 = arith.constant 0 : i32
    return %arg0, %c0_i32 : i32, i32
  }
}

</mosaic_0001>

<bundles_post_ra>
// kernel: tpu_custom_call.1
= control target key start
LH: loop header
LB: loop body
LE: loop exit
PB: predicated region body
PF: predicated region fallthrough
CT: control target
= control target key end

     0   :  { %11 = vsyncpa [#allocation4], 0  ;;  %s861_s0 = inlined_call_operand.hbm [shape: s32[8,5], index: 0, kind: input, shape index: {}]   ;;  %s862_s1 = inlined_call_operand.vmem [shape: f32[128,32], index: 1, kind: input, shape index: {}]   ;;  %s863_s2 = inlined_call_operand.vmem [shape: f32[5,32,32], index: 2, kind: input, shape index: {}]   ;;  %s864_s3 = inlined_call_operand.vmem [shape: f32[1,32], index: 3, kind: input, shape index: {}]   ;;  %s865_s4 = inlined_call_operand.hbm [shape: f32[32,128], index: 4, kind: input, shape index: {}]   ;;  %s866_s5 = inlined_call_operand.vmem [shape: f32[1,128], index: 5, kind: input, shape index: {}]   ;;  %s867_s6 = inlined_call_operand.hbm [shape: f32[8,128], index: 6, kind: output, shape index: {}]  }
   0x1   :  { %12 = vsyncpa [#allocation7], 0 }
   0x2   :  { %13 = vsyncpa [#allocation5], 0  ;;  %s19_s23 = sshll.u32 %s861_s0, 4  ;;  %s548_s24 = smov [#allocation3]   ;;  %s20_s23 = int_to_ptr.hbm [resolvable:$true] %s19_s23 }
   0x3   :  { %s21_s25 = sshll.u32 %s548_s24, 4  ;;  %s35_s28 = sshll.u32 %s865_s4, 4  ;;  %s22_s25 = int_to_ptr.vmem [resolvable:$true] %s21_s25  ;;  %s36_s28 = int_to_ptr.hbm [resolvable:$true] %s35_s28 }
   0x4   :  { %24 = dma.hbm_to_vmem [thread:$0]  %s20_s23, 128, %s22_s25, [#allocation4]  }
   0x5   :  { %s549_s29 = smov [#allocation6]   ;;  %s550_s7 = smov 128  }
   0x6   :  { %s37_s30 = sshll.u32 %s549_s29, 4  ;;  %s551_s8 = smov 8   ;;  %s38_s30 = int_to_ptr.vmem [resolvable:$true] %s37_s30 }
   0x7   :  { %43 = dma.hbm_to_vmem [thread:$0]  %s36_s28, 512, %s38_s30, [#allocation7], %s550_s7, %s550_s7, %s551_s8  }
   0x8   :  { %542 = dma.done.wait [#allocation4], 128  }
   0x9   :  { %543 = vsyncadd [#allocation4], 4294967168 }
   0xa   :  { %544 = dma.done.wait [#allocation7], 512  }
   0xb   :  { %545 = vsyncadd [#allocation7], 4294966784  ;;  %v552_v0 = vmov 0   ;;  %v601_v1 = vld [vmem:[#allocation3] sm:$0xff]  ;;  %v606_v2 = vld [vmem:[%s862_s1 + $0x78] sm:$0xff]  ;;  %v553_v8 = vmov 1   ;;  %v71_v24 = vlaneseq }
   0xc   :  { %460 = vset.pattern.permute.xlu0 %v552_v0  ;;  %v611_v3 = vld [vmem:[%s862_s1 + $0x70] sm:$0xff]  ;;  %81 = vmatpush.msra.mxu0 %v606_v2  ;;  %v618_v4 = vld [vmem:[%s862_s1 + $0x68] sm:$0xff]  ;;  %v625_v5 = vld [vmem:[%s862_s1 + $0x60] sm:$0xff]  ;;  %v554_v21 = vmov 2   ;;  %v555_v27 = vmov 1.0   ;;  %v556_v34 = vmov 3  }
   0xd   :  { %76 = vperm.xlu0 %460, %v601_v1   ;;  %137 = vmatpush.msra.mxu2 %v606_v2  ;;  %v632_v6 = vld [vmem:[%s862_s1 + $0x58] sm:$0xff]  ;;  %v639_v7 = vld [vmem:[%s862_s1 + $0x50] sm:$0xff]  ;;  %v647_v9 = vld [vmem:[%s862_s1 + $0x48] sm:$0xff]  ;;  %v748_v25 = vand.u32 127, %v71_v24  ;;  %v557_v35 = vmov 4   ;;  %vm73_vm2 = vcmask 261120  }
   0xe   :  { %82 = vmatpush.msra.mxu0 %v611_v3  ;;  %v654_v10 = vld [vmem:[%s862_s1 + $0x40] sm:$0xff]  ;;  %v661_v11 = vld [vmem:[%s862_s1 + $0x38] sm:$0xff]  ;;  %v668_v12 = vld [vmem:[%s862_s1 + $0x30] sm:$0xff]  ;;  %462 = vset.pattern.permute.xlu1 %v554_v21  ;;  %v558_v39 = vmov 0.0   ;;  %s559_s28 = smov [#allocation8]   ;;  %s405_s8 = sshll.u32 %s867_s6, 4  ;;  %s406_s8 = int_to_ptr.hbm [resolvable:$true] %s405_s8 }
   0xf   :  { %138 = vmatpush.msra.mxu2 %v611_v3  ;;  %v675_v13 = vld [vmem:[%s862_s1 + $0x28] sm:$0xff]  ;;  %v682_v14 = vld [vmem:[%s862_s1 + $0x20] sm:$0xff]  ;;  %v689_v15 = vld [vmem:[%s862_s1 + $0x18] sm:$0xff]  ;;  %189 = vperm.xlu1 %462, %v601_v1   ;;  %74 = vst.msk [vmem:[#allocation2] sm:$0xff] %vm73_vm2, %v558_v39  ;;  %s403_s29 = sshll.u32 %s559_s28, 4  ;;  %s404_s29 = int_to_ptr.vmem [resolvable:$true] %s403_s29 }
  0x10   :  { %83 = vmatpush.msra.mxu0 %v618_v4  ;;  %v696_v16 = vld [vmem:[%s862_s1 + $0x10] sm:$0xff]  ;;  %v703_v17 = vld [vmem:[%s862_s1 + $0x8] sm:$0xff]  ;;  %v713_v18 = vld [vmem:[%s862_s1] sm:$0xff]  ;;  %464 = vset.pattern.permute.xlu2 %v557_v35 }
  0x11   :  { %139 = vmatpush.msra.mxu2 %v618_v4  ;;  %v105_v19 = vld [vmem:[%s863_s2 + $0x18] sm:$0xff]  ;;  %v104_v20 = vld [vmem:[%s863_s2 + $0x10] sm:$0xff]  ;;  %v103_v22 = vld [vmem:[%s863_s2 + $0x8] sm:$0xff]  ;;  %303 = vperm.xlu2 %464, %v601_v1  }
  0x12   :  { %84 = vmatpush.msra.mxu0 %v625_v5  ;;  %121 = vmatpush.msra.mxu1 %v105_v19  ;;  %v102_v23 = vld [vmem:[%s863_s2] sm:$0xff]  ;;  %v424_v29 = vld [vmem:[%s863_s2 + $0x38] sm:$0xff]  ;;  %v423_v30 = vld [vmem:[%s863_s2 + $0x30] sm:$0xff] }
  0x13   :  { %140 = vmatpush.msra.mxu2 %v625_v5  ;;  %178 = vmatpush.msra.mxu3 %v424_v29  ;;  %v422_v31 = vld [vmem:[%s863_s2 + $0x28] sm:$0xff]  ;;  %v421_v32 = vld [vmem:[%s863_s2 + $0x20] sm:$0xff]  ;;  %v431_v33 = vld [vmem:[%s863_s2 + $0x58] sm:$0xff] }
  0x14   :  { %85 = vmatpush.msra.mxu0 %v632_v6  ;;  %122 = vmatpush.msra.mxu1 %v104_v20  ;;  %v430_v36 = vld [vmem:[%s863_s2 + $0x50] sm:$0xff]  ;;  %v429_v37 = vld [vmem:[%s863_s2 + $0x48] sm:$0xff]  ;;  %v428_v38 = vld [vmem:[%s863_s2 + $0x40] sm:$0xff] }
  0x15   :  { %461 = vset.pattern.permute.xlu0 %v553_v8  ;;  %141 = vmatpush.msra.mxu2 %v632_v6  ;;  %v438_v52 = vld [vmem:[%s863_s2 + $0x78] sm:$0xff]  ;;  %v437_v53 = vld [vmem:[%s863_s2 + $0x70] sm:$0xff]  ;;  %v436_v54 = vld [vmem:[%s863_s2 + $0x68] sm:$0xff] }
  0x16   :  { %132 = vperm.xlu0 %461, %v601_v1   ;;  %86 = vmatpush.msra.mxu0 %v639_v7  ;;  %v101_v44 = vld [vmem:[#allocation2] sm:$0xff]  ;;  %v445_v56 = vld [vmem:[%s863_s2 + $0x98] sm:$0xff]  ;;  %v444_v57 = vld [vmem:[%s863_s2 + $0x90] sm:$0xff] }
  0x17   :  { %142 = vmatpush.msra.mxu2 %v639_v7  ;;  %123 = vmatpush.msra.mxu1 %v103_v22  ;;  %v435_v55 = vld [vmem:[%s863_s2 + $0x60] sm:$0xff]  ;;  %v443_v58 = vld [vmem:[%s863_s2 + $0x88] sm:$0xff] }
  0x18   :  { %87 = vmatpush.msra.mxu0 %v647_v9  ;;  %179 = vmatpush.msra.mxu3 %v423_v30  ;;  %v442_v59 = vld [vmem:[%s863_s2 + $0x80] sm:$0xff] }
  0x19   :  { %143 = vmatpush.msra.mxu2 %v647_v9  ;;  %124 = vmatpush.msra.mxu1 %v102_v23 }
  0x1a   :  { %88 = vmatpush.msra.mxu0 %v654_v10  ;;  %180 = vmatpush.msra.mxu3 %v422_v31 }
  0x1b   :  { %144 = vmatpush.msra.mxu2 %v654_v10  ;;  %194 = vmatpush.msrb.mxu1 %v606_v2 }
  0x1c   :  { %89 = vmatpush.msra.mxu0 %v661_v11  ;;  %181 = vmatpush.msra.mxu3 %v421_v32 }
  0x1d   :  { %145 = vmatpush.msra.mxu2 %v661_v11  ;;  %195 = vmatpush.msrb.mxu1 %v611_v3 }
  0x1e   :  { %90 = vmatpush.msra.mxu0 %v668_v12  ;;  %463 = vset.pattern.permute.xlu1 %v556_v34 }
  0x1f   :  { %146 = vmatpush.msra.mxu2 %v668_v12  ;;  %196 = vmatpush.msrb.mxu1 %v618_v4 }
  0x20   :  { %91 = vmatpush.msra.mxu0 %v675_v13  ;;  %246 = vperm.xlu1 %463, %v601_v1   ;;  %v369_v1 = vld [vmem:[#allocation6 + $0x18] sm:$0xff] }
  0x21   :  { %147 = vmatpush.msra.mxu2 %v675_v13  ;;  %197 = vmatpush.msrb.mxu1 %v625_v5 }
  0x22   :  { %92 = vmatpush.msra.mxu0 %v682_v14  ;;  %235 = vmatpush.msrb.mxu3 %v431_v33 }
  0x23   :  { %148 = vmatpush.msra.mxu2 %v682_v14  ;;  %198 = vmatpush.msrb.mxu1 %v632_v6 }
  0x24   :  { %93 = vmatpush.msra.mxu0 %v689_v15  ;;  %465 = vset.pattern.permute.xlu0 %v557_v35 }
  0x25   :  { %149 = vmatpush.msra.mxu2 %v689_v15  ;;  %199 = vmatpush.msrb.mxu1 %v639_v7 }
  0x26   :  { %94 = vmatpush.msra.mxu0 %v696_v16  ;;  %236 = vmatpush.msrb.mxu3 %v430_v36 }
  0x27   :  { %150 = vmatpush.msra.mxu2 %v696_v16  ;;  %200 = vmatpush.msrb.mxu1 %v647_v9 }
  0x28   :  { %95 = vmatpush.msra.mxu0 %v703_v17  ;;  %237 = vmatpush.msrb.mxu3 %v429_v37 }
  0x29   :  { %151 = vmatpush.msra.mxu2 %v703_v17  ;;  %201 = vmatpush.msrb.mxu1 %v654_v10 }
  0x2a   :  { %96 = vmatpush.msra.mxu0 %v713_v18  ;;  %238 = vmatpush.msrb.mxu3 %v428_v38 }
  0x2b   :  { %152 = vmatpush.msra.mxu2 %v713_v18  ;;  %202 = vmatpush.msrb.mxu1 %v661_v11 }
  0x2c   :  { %292 = vmatpush.msrb.mxu0 %v438_v52 }
  0x2d   :  { %308 = vmatpush.msrb.mxu2 %v606_v2  ;;  %203 = vmatpush.msrb.mxu1 %v668_v12 }
  0x2e   :  { %293 = vmatpush.msrb.mxu0 %v437_v53 }
  0x2f   :  { %309 = vmatpush.msrb.mxu2 %v611_v3  ;;  %204 = vmatpush.msrb.mxu1 %v675_v13 }
  0x30   :  { %294 = vmatpush.msrb.mxu0 %v436_v54 }
  0x31   :  { %310 = vmatpush.msrb.mxu2 %v618_v4  ;;  %205 = vmatpush.msrb.mxu1 %v682_v14 }
  0x32   :  { %295 = vmatpush.msrb.mxu0 %v435_v55 }
  0x33   :  { %311 = vmatpush.msrb.mxu2 %v625_v5  ;;  %206 = vmatpush.msrb.mxu1 %v689_v15 }
  0x35   :  { %312 = vmatpush.msrb.mxu2 %v632_v6  ;;  %207 = vmatpush.msrb.mxu1 %v696_v16 }
  0x37   :  { %313 = vmatpush.msrb.mxu2 %v639_v7  ;;  %208 = vmatpush.msrb.mxu1 %v703_v17 }
  0x39   :  { %314 = vmatpush.msrb.mxu2 %v647_v9  ;;  %209 = vmatpush.msrb.mxu1 %v713_v18 }
  0x3b   :  { %315 = vmatpush.msrb.mxu2 %v654_v10 }
  0x3d   :  { %316 = vmatpush.msrb.mxu2 %v661_v11 }
  0x3f   :  { %317 = vmatpush.msrb.mxu2 %v668_v12 }
  0x41   :  { %318 = vmatpush.msrb.mxu2 %v675_v13 }
  0x43   :  { %319 = vmatpush.msrb.mxu2 %v682_v14 }
  0x45   :  { %320 = vmatpush.msrb.mxu2 %v689_v15 }
  0x47   :  { %321 = vmatpush.msrb.mxu2 %v696_v16 }
  0x49   :  { %322 = vmatpush.msrb.mxu2 %v703_v17 }
  0x4b   :  { %323 = vmatpush.msrb.mxu2 %v713_v18 }
  0x6b   :  { %v304_v43 = vpop.permute.xlu2 %303 }
  0x6c   :  { %vm305_vm4 = vcmp.eq.s32.totalorder %v304_v43, %v748_v25 }
  0x7f   :  { %v77_v26 = vpop.permute.xlu0 %76 }
  0x80   :  { %vm78_vm0 = vcmp.eq.s32.totalorder %v77_v26, %v748_v25 }
  0x81   :  { %417 = vmatmul.msk.f32.vlgmr.msra.gmra.mxu0 %vm78_vm0, %v555_v27  ;;  %v190_v41 = vpop.permute.xlu1 %189 }
  0x82   :  { %vm191_vm3 = vcmp.eq.s32.totalorder %v190_v41, %v748_v25  ;;  %349 = vmatpush.msra.mxu0 %v445_v56 }
  0x84   :  { %350 = vmatpush.msra.mxu0 %v444_v57 }
  0x86   :  { %351 = vmatpush.msra.mxu0 %v443_v58 }
  0x88   :  { %v133_v28 = vpop.permute.xlu0 %132  ;;  %352 = vmatpush.msra.mxu0 %v442_v59 }
  0x89   :  { %vm134_vm1 = vcmp.eq.s32.totalorder %v133_v28, %v748_v25 }
  0x8a   :  { %420 = vmatmul.msk.f32.vlgmr.msra.gmra.mxu2 %vm134_vm1, %v555_v27 }
  0x92   :  { %441 = vmatmul.msk.f32.vlgmr.msrb.gmra.mxu2 %vm305_vm4, %v555_v27  ;;  %v247_v48 = vpop.permute.xlu1 %246 }
  0x93   :  { %vm248_vm5 = vcmp.eq.s32.totalorder %v247_v48, %v748_v25 }
  0xfe   :  { %v98_v40 = vpop.f32.mrf.mxu0 }
  0xff   :  { %418 = vmatmul.msk.f32.vlgmr.msra.gmra.mxu1 %vm73_vm2, %v98_v40 }
 0x100   :  { %389 = vmatpush.msra.mxu1 %v369_v1 }
 0x107   :  { %427 = vmatmul.msk.f32.vlgmr.msrb.gmra.mxu1 %vm191_vm3, %v555_v27 }
 0x10d   :  { %v154_v42 = vpop.f32.mrf.mxu2 }
 0x10e   :  { %425 = vmatmul.msk.f32.vlgmr.msra.gmra.mxu3 %vm73_vm2, %v154_v42 }
 0x10f   :  { %251 = vmatpush.msra.mxu3 %v606_v2  ;;  %v368_v2 = vld [vmem:[#allocation6 + $0x10] sm:$0xff] }
 0x110   :  { %390 = vmatpush.msra.mxu1 %v368_v2 }
 0x111   :  { %252 = vmatpush.msra.mxu3 %v611_v3  ;;  %v367_v3 = vld [vmem:[#allocation6 + $0x8] sm:$0xff] }
 0x112   :  { %391 = vmatpush.msra.mxu1 %v367_v3 }
 0x113   :  { %253 = vmatpush.msra.mxu3 %v618_v4  ;;  %v366_v4 = vld [vmem:[#allocation6] sm:$0xff] }
 0x114   :  { %392 = vmatpush.msra.mxu1 %v366_v4 }
 0x115   :  { %254 = vmatpush.msra.mxu3 %v625_v5  ;;  %v325_v0 = vpop.f32.mrf.mxu2 }
 0x117   :  { %255 = vmatpush.msra.mxu3 %v632_v6 }
 0x119   :  { %256 = vmatpush.msra.mxu3 %v639_v7 }
 0x11b   :  { %257 = vmatpush.msra.mxu3 %v647_v9 }
 0x11d   :  { %258 = vmatpush.msra.mxu3 %v654_v10 }
 0x11f   :  { %259 = vmatpush.msra.mxu3 %v661_v11  ;;  %v466_v11 = vld [vmem:[%s864_s3] ss:$0 sm:$0xff] }
 0x121   :  { %260 = vmatpush.msra.mxu3 %v668_v12 }
 0x123   :  { %261 = vmatpush.msra.mxu3 %v675_v13 }
 0x125   :  { %262 = vmatpush.msra.mxu3 %v682_v14 }
 0x127   :  { %263 = vmatpush.msra.mxu3 %v689_v15  ;;  %v467_v15 = vld [vmem:[%s866_s5] ss:$0 sm:$0xff] }
 0x129   :  { %264 = vmatpush.msra.mxu3 %v696_v16 }
 0x12b   :  { %265 = vmatpush.msra.mxu3 %v703_v17 }
 0x12d   :  { %266 = vmatpush.msra.mxu3 %v713_v18 }
 0x17c   :  { %v126_v45 = vpop.f32.mrf.mxu1 }
 0x17d   :  { %v129_v46 = vadd.f32 %v126_v45, %v101_v44 }
 0x17f   :  { %130 = vst.msk [vmem:[#allocation2] sm:$0xff] %vm73_vm2, %v129_v46 }
 0x184   :  { %v211_v47 = vpop.f32.mrf.mxu1 }
 0x185   :  { %432 = vmatmul.msk.f32.vlgmr.msrb.gmra.mxu3 %vm73_vm2, %v211_v47 }
 0x186   :  { %v157_v49 = vld [vmem:[#allocation2] sm:$0xff] }
 0x18d   :  { %434 = vmatmul.msk.f32.vlgmr.msra.gmra.mxu3 %vm248_vm5, %v555_v27 }
 0x191   :  { %v183_v50 = vpop.f32.mrf.mxu3 }
 0x192   :  { %v186_v51 = vadd.f32 %v183_v50, %v157_v49 }
 0x194   :  { %187 = vst.msk [vmem:[#allocation2] sm:$0xff] %vm73_vm2, %v186_v51 }
 0x19b   :  { %v214_v60 = vld [vmem:[#allocation2] sm:$0xff] }
 0x208   :  { %v240_v61 = vpop.f32.mrf.mxu3 }
 0x209   :  { %v243_v62 = vadd.f32 %v240_v61, %v214_v60 }
 0x20b   :  { %244 = vst.msk [vmem:[#allocation2] sm:$0xff] %vm73_vm2, %v243_v62 }
 0x210   :  { %v268_v63 = vpop.f32.mrf.mxu3 }
 0x211   :  { %439 = vmatmul.msk.f32.vlgmr.msrb.gmra.mxu0 %vm73_vm2, %v268_v63 }
 0x212   :  { %v271_v5 = vld [vmem:[#allocation2] sm:$0xff] }
 0x219   :  { %446 = vmatmul.msk.f32.vlgmr.msra.gmra.mxu0 %vm73_vm2, %v325_v0 }
 0x28e   :  { %v297_v6 = vpop.f32.mrf.mxu0 }
 0x28f   :  { %v300_v7 = vadd.f32 %v297_v6, %v271_v5 }
 0x291   :  { %301 = vst.msk [vmem:[#allocation2] sm:$0xff] %vm73_vm2, %v300_v7 }
 0x296   :  { %v354_v8 = vpop.f32.mrf.mxu0 }
 0x298   :  { %v328_v9 = vld [vmem:[#allocation2] sm:$0xff] }
 0x299   :  { %v357_v10 = vadd.f32 %v354_v8, %v328_v9 }
 0x29b   :  { %358 = vst.msk [vmem:[#allocation2] sm:$0xff] %vm73_vm2, %v357_v10 }
 0x2a2   :  { %v359_v12 = vld [vmem:[#allocation2] sm:$0xff] }
 0x2a3   :  { %v364_v13 = vadd.f32 %v466_v11, %v359_v12 }
 0x2a5   :  { %468 = vtanh.f32 %v364_v13 }
 0x2ab   :  { %v469_v14 = vpop.eup %468 }
 0x2ac   :  { %447 = vmatmul.msk.f32.vlgmr.msra.gmra.mxu1 %vm73_vm2, %v469_v14 }
 0x329   :  { %v394_v16 = vpop.f32.mrf.mxu1 }
 0x32a   :  { %v395_v17 = vadd.f32 %v467_v15, %v394_v16 }
 0x32c   :  { %397 = vst [vmem:[#allocation8] sm:$0xff] %v395_v17 }
 0x32d   :  { %408 = dma.vmem_to_hbm [thread:$0]  %s404_s29, 128, %s406_s8, [#allocation5]  }
 0x32e   :  { %546 = dma.done.wait [#allocation5], 128  }
 0x32f   :  { %547 = vsyncadd [#allocation5], 4294967168 }
 0x330   :  { %413 = vsyncpa [#allocation4], 1 }
 0x331   :  { %414 = vsyncpa [#allocation7], 1 }
 0x332   :  { %415 = vsyncpa [#allocation5], 1 }

</bundles_post_ra>
